<compile_context>
chip_gen: v7x
topology: tpu7x:2x2x1
jax: 0.10.0
libtpu: 0.0.40
codegen_flags: <defaults>
</compile_context>

<pallas_src>
import math

import jax
import jax.numpy as jnp
from jax.experimental import pallas as pl
from jax.experimental.pallas import tpu as pltpu


def _cdiv(a, b):
    return -(-a // b)


def _round_up(x, m):
    return ((x + m - 1) // m) * m


def _vmem_capacity_bytes():
    """Best-effort physical VMEM capacity; conservative fallback (v7x per-TC)."""
    try:
        cap = int(pltpu.get_tpu_info().vmem_capacity_bytes)
        if cap > 0:
            return cap
    except Exception:
        pass
    return 64 << 20


def proj_loss_ref(att_h_feats, ori_h_feats, guide_feats):
    """Pure-JAX reference mirroring the PyTorch module (also the tiny-input path)."""
    n = att_h_feats.shape[0]
    att = att_h_feats.reshape(n, -1).astype(jnp.float32)
    ori = ori_h_feats.reshape(n, -1).astype(jnp.float32)
    guide = guide_feats.reshape(n, -1).astype(jnp.float32)
    guide = guide / jnp.linalg.norm(guide, axis=1, keepdims=True)
    return jnp.sum((att - ori) * guide) / n


def _make_proj_loss_kernel(kt_per_split, tile_d, d_rows, ragged):
    """Accumulate per-row <att - ori, guide> and ||guide||^2 over feature tiles.

    Grid = (num_splits, tiles_per_split).  Axis 0 is "parallel" (sharded
    across TensorCores on 2-TC chips); axis 1 is the sequential reduction
    over feature tiles.  Per-split output blocks have a k-independent index
    map, so they stay resident in VMEM and act as accumulators.
    """

    def kernel(att_ref, ori_ref, guide_ref, dot_ref, sq_ref):
        p = pl.program_id(0)
        k = pl.program_id(1)

        @pl.when(k == 0)
        def _init():
            dot_ref[...] = jnp.zeros_like(dot_ref)
            sq_ref[...] = jnp.zeros_like(sq_ref)

        g = guide_ref[...].astype(jnp.float32)
        diff = att_ref[...].astype(jnp.float32) - ori_ref[...].astype(jnp.float32)

        if ragged:
            # Only traced when a ragged / fully out-of-range tile can occur.
            # Mask must zero BOTH contributions (dot and ||g||^2), and must be
            # applied before the products so OOB garbage (possibly NaN/inf)
            # cannot propagate through the sums.
            start = (p * kt_per_split + k) * tile_d
            lane = jax.lax.broadcasted_iota(jnp.int32, g.shape, 1)
            valid = (lane + start) < d_rows
            zero = jnp.zeros((), jnp.float32)
            g = jnp.where(valid, g, zero)
            diff = jnp.where(valid, diff, zero)

        # Per-row partial reductions over this feature tile -> (rows,1) -> (1,rows,1)
        dot_ref[...] += jnp.sum(diff * g, axis=1, keepdims=True)[None]
        sq_ref[...] += jnp.sum(g * g, axis=1, keepdims=True)[None]

    return kernel


def proj_loss(att_h_feats, ori_h_feats, guide_feats, *,
              max_tile_d=65536, min_pallas_bytes=1 << 20):
    """Pallas implementation of Proj_Loss.forward. Returns a scalar float32."""
    n_imgs = att_h_feats.shape[0]
    d = 1
    for dim in att_h_feats.shape[1:]:
        d *= dim

    itemsizes = [jnp.dtype(x.dtype).itemsize
                 for x in (att_h_feats, ori_h_feats, guide_feats)]
    sum_itemsize = sum(itemsizes)
    total_bytes = n_imgs * d * sum_itemsize

    # --- small-input fast path: pallas_call setup overhead dominates here.
    if total_bytes < min_pallas_bytes:
        return proj_loss_ref(att_h_feats, ori_h_feats, guide_feats)

    # --- dtype-aware sublane packing: split each image row into `s` sub-rows
    # so the rows dim (second-to-last of the block) fills packed sublanes.
    pack = max(8, 32 // max(min(itemsizes), 1))     # 8 f32 / 16 bf16 / 32 int8
    s = pack // math.gcd(n_imgs, pack)              # n_imgs * s multiple of pack
    while s > 1 and d % s != 0:                     # exact split only (no padding)
        s //= 2
    rows = n_imgs * s
    d_rows = d // s

    # --- feature tile sized from a generation-aware VMEM budget:
    #     3 input streams x 2 pipeline buffers x rows x tile_d bytes.
    n_buf = 2
    vmem_cap = _vmem_capacity_bytes()
    budget = min(vmem_cap // 2, 56 << 20)
    bytes_per_lane = n_buf * rows * sum_itemsize
    tile_cap = max(128, (budget // bytes_per_lane) // 128 * 128)
    max_tile_d = max(128, (int(max_tile_d) // 128) * 128)
    tile_d = int(min(tile_cap, max_tile_d, _round_up(d_rows, 128)))

    kt_total = _cdiv(d_rows, tile_d)
    if kt_total == 1 and d_rows >= 256:
        # Force a 2-way split so both TensorCores pull HBM on 2-TC chips (v7x);
        # on 1-TC chips this is just a 2-step sequential loop.
        tile_d = _round_up(_cdiv(d_rows, 2), 128)
        kt_total = _cdiv(d_rows, tile_d)
    num_splits = 2 if kt_total >= 2 else 1
    kt_per_split = _cdiv(kt_total, num_splits)

    ragged = (d_rows % tile_d != 0) or (num_splits * kt_per_split != kt_total)
    last_blk = kt_total - 1

    # Row-major reshape: free view, no data movement, no padding.
    att_p = att_h_feats.reshape(rows, d_rows)
    ori_p = ori_h_feats.reshape(rows, d_rows)
    guide_p = guide_feats.reshape(rows, d_rows)

    def feat_index_map(p, k):
        # Clamp so a fully out-of-range step (odd kt_total split two ways)
        # just re-reads the last block; the lane mask zeroes its contribution.
        return (0, jnp.minimum(p * kt_per_split + k, last_blk))

    feat_spec = pl.BlockSpec((rows, tile_d), feat_index_map)
    part_spec = pl.BlockSpec((1, rows, 1), lambda p, k: (p, 0, 0))
    part_shape = jax.ShapeDtypeStruct((num_splits, rows, 1), jnp.float32)

    vmem_needed = n_buf * rows * tile_d * sum_itemsize + (4 << 20)
    vmem_limit = int(min(max(vmem_needed, 16 << 20),
                         max(vmem_cap * 3 // 4, 16 << 20)))

    kernel = _make_proj_loss_kernel(kt_per_split, tile_d, d_rows, ragged)

    dot_part, sq_part = pl.pallas_call(
        kernel,
        out_shape=(part_shape, part_shape),
        grid_spec=pltpu.PrefetchScalarGridSpec(
            num_scalar_prefetch=0,
            grid=(num_splits, kt_per_split),
            in_specs=[feat_spec, feat_spec, feat_spec],
            out_specs=(part_spec, part_spec),
        ),
        compiler_params=pltpu.CompilerParams(
            # pltpu.CORE_PARALLEL on axis 0 could pin the split to the two v7x
            # TensorCores; plain "parallel" is the portable, safe choice.
            dimension_semantics=("parallel", "arbitrary"),
            vmem_limit_bytes=vmem_limit,
        ),
    )(att_p, ori_p, guide_p)

    # Tiny exact epilogue: combine splits and sub-rows, then normalize.
    dot_rows = jnp.sum(dot_part[:, :, 0], axis=0)       # (rows,)
    sq_rows = jnp.sum(sq_part[:, :, 0], axis=0)         # (rows,)
    dot_img = dot_rows.reshape(n_imgs, s).sum(axis=1)   # (n_imgs,)
    sq_img = sq_rows.reshape(n_imgs, s).sum(axis=1)     # (n_imgs,)
    # All-zero guide row -> inf/NaN, same as the PyTorch reference.
    return jnp.sum(dot_img / jnp.sqrt(sq_img)) / n_imgs


if __name__ == "__main__":
    key = jax.random.PRNGKey(0)
    k1, k2, k3 = jax.random.split(key, 3)

    # 1) Nominal module shapes: n_imgs=2, hidden feature maps (4,16,16).
    n_imgs, C, H, W = 2, 4, 16, 16
    ori = jax.random.normal(k1, (n_imgs, C, H, W), dtype=jnp.float32)
    gui = jax.random.normal(k2, (n_imgs, C, H, W), dtype=jnp.float32)
    att = jax.random.normal(k3, (n_imgs, C, H, W), dtype=jnp.float32)
    ref = jax.block_until_ready(proj_loss_ref(att, ori, gui))

    # 1a) Default call -> small-input fast path (fused XLA, no pallas_call).
    loss_fast = jax.block_until_ready(proj_loss(att, ori, gui))
    assert jnp.allclose(loss_fast, ref, rtol=1e-4, atol=1e-5), (loss_fast, ref)

    # 1b) Same inputs through the Pallas kernel: dense sublane packing
    #     (s=4, rows=8) + forced 2-way split (two 128-lane tiles).
    loss_pal = jax.block_until_ready(proj_loss(att, ori, gui, min_pallas_bytes=0))
    assert jnp.allclose(loss_pal, ref, rtol=1e-4, atol=1e-5), (loss_pal, ref)

    # 2) Multi-tile reduction per split (kt_per_split > 1), no ragged tail.
    k4, k5, k6 = jax.random.split(jax.random.PRNGKey(1), 3)
    shp2 = (2, 4, 32, 32)                      # D = 4096, d_rows = 1024
    ori2 = jax.random.normal(k4, shp2, dtype=jnp.float32)
    gui2 = jax.random.normal(k5, shp2, dtype=jnp.float32)
    att2 = jax.random.normal(k6, shp2, dtype=jnp.float32)
    loss2 = jax.block_until_ready(
        proj_loss(att2, ori2, gui2, min_pallas_bytes=0, max_tile_d=128))
    ref2 = jax.block_until_ready(proj_loss_ref(att2, ori2, gui2))
    assert jnp.allclose(loss2, ref2, rtol=1e-4, atol=1e-5), (loss2, ref2)

    # 3) Ragged feature length (D = 663, odd) and non-power-of-two n_imgs:
    #    in-kernel lane masking, no input padding, rows = 3.
    k7, k8, k9 = jax.random.split(jax.random.PRNGKey(2), 3)
    shp3 = (3, 3, 17, 13)
    ori3 = jax.random.normal(k7, shp3, dtype=jnp.float32)
    gui3 = jax.random.normal(k8, shp3, dtype=jnp.float32)
    att3 = jax.random.normal(k9, shp3, dtype=jnp.float32)
    loss3 = jax.block_until_ready(proj_loss(att3, ori3, gui3, min_pallas_bytes=0))
    ref3 = jax.block_until_ready(proj_loss_ref(att3, ori3, gui3))
    assert jnp.allclose(loss3, ref3, rtol=1e-4, atol=1e-5), (loss3, ref3)

    # 4) Odd tile count split two ways -> one fully-masked step, exercising
    #    the clamped index_map (D = 315, 128-lane tiles -> 3 tiles).
    kA, kB, kC = jax.random.split(jax.random.PRNGKey(3), 3)
    shp4 = (2, 5, 9, 7)
    ori4 = jax.random.normal(kA, shp4, dtype=jnp.float32)
    gui4 = jax.random.normal(kB, shp4, dtype=jnp.float32)
    att4 = jax.random.normal(kC, shp4, dtype=jnp.float32)
    loss4 = jax.block_until_ready(
        proj_loss(att4, ori4, gui4, min_pallas_bytes=0, max_tile_d=128))
    ref4 = jax.block_until_ready(proj_loss_ref(att4, ori4, gui4))
    assert jnp.allclose(loss4, ref4, rtol=1e-4, atol=1e-5), (loss4, ref4)

    # 5) bf16 inputs: dtype-aware sublane packing (s=8, rows=16).
    att5 = att.astype(jnp.bfloat16)
    ori5 = ori.astype(jnp.bfloat16)
    gui5 = gui.astype(jnp.bfloat16)
    loss5 = jax.block_until_ready(proj_loss(att5, ori5, gui5, min_pallas_bytes=0))
    ref5 = jax.block_until_ready(proj_loss_ref(att5, ori5, gui5))
    assert jnp.allclose(loss5, ref5, rtol=1e-3, atol=1e-3), (loss5, ref5)

    print("KERNEL_OK")
</pallas_src>

<mosaic_0001>
module attributes {stable_mosaic.version = 11 : i64} {
  func.func @kernel(%arg0: i32, %arg1: i32, %arg2: memref<8x128xf32, #tpu.memory_space<vmem>>, %arg3: memref<8x128xf32, #tpu.memory_space<vmem>>, %arg4: memref<8x128xf32, #tpu.memory_space<vmem>>, %arg5: memref<1x8x1xf32, #tpu.memory_space<vmem>>, %arg6: memref<1x8x1xf32, #tpu.memory_space<vmem>>) attributes {dimension_semantics = [#tpu.dimension_semantics<parallel>, #tpu.dimension_semantics<arbitrary>], iteration_bounds = array<i64: 2, 1>, scalar_prefetch = 0 : i64, scratch_operands = 0 : i64, tpu.core_type = #tpu.core_type<tc>, window_params = [{transform_indices = @transform_0, window_bounds = array<i64: 8, 128>}, {transform_indices = @transform_1, window_bounds = array<i64: 8, 128>}, {transform_indices = @transform_2, window_bounds = array<i64: 8, 128>}, {transform_indices = @transform_3, window_bounds = array<i64: 1, 8, 1>}, {transform_indices = @transform_4, window_bounds = array<i64: 1, 8, 1>}]} {
    %c0_i32 = arith.constant 0 : i32
    %0 = arith.cmpi eq, %arg1, %c0_i32 : i32
    %1 = arith.extui %0 : i1 to i32
    %c0_i32_0 = arith.constant 0 : i32
    %2 = arith.cmpi ne, %1, %c0_i32_0 : i32
    scf.if %2 {
      %cst_19 = arith.constant 0.000000e+00 : f32
      %21 = vector.broadcast %cst_19 : f32 to vector<1x8x1xf32>
      %c0_20 = arith.constant 0 : index
      %c0_21 = arith.constant 0 : index
      %c0_22 = arith.constant 0 : index
      %22 = vector.load %arg5[%c0_20, %c0_21, %c0_22] : memref<1x8x1xf32, #tpu.memory_space<vmem>>, vector<1x8x1xf32>
      tpu.vector_store %arg5[%c0_20, %c0_21, %c0_22], %21 {strides = array<i32>} : memref<1x8x1xf32, #tpu.memory_space<vmem>>, vector<1x8x1xf32>,
      %cst_23 = arith.constant 0.000000e+00 : f32
      %23 = vector.broadcast %cst_23 : f32 to vector<1x8x1xf32>
      %c0_24 = arith.constant 0 : index
      %c0_25 = arith.constant 0 : index
      %c0_26 = arith.constant 0 : index
      %24 = vector.load %arg6[%c0_24, %c0_25, %c0_26] : memref<1x8x1xf32, #tpu.memory_space<vmem>>, vector<1x8x1xf32>
      tpu.vector_store %arg6[%c0_24, %c0_25, %c0_26], %23 {strides = array<i32>} : memref<1x8x1xf32, #tpu.memory_space<vmem>>, vector<1x8x1xf32>,
    } else {
    }
    %c0 = arith.constant 0 : index
    %c0_1 = arith.constant 0 : index
    %3 = vector.load %arg4[%c0, %c0_1] : memref<8x128xf32, #tpu.memory_space<vmem>>, vector<8x128xf32>
    %c0_2 = arith.constant 0 : index
    %c0_3 = arith.constant 0 : index
    %4 = vector.load %arg2[%c0_2, %c0_3] : memref<8x128xf32, #tpu.memory_space<vmem>>, vector<8x128xf32>
    %c0_4 = arith.constant 0 : index
    %c0_5 = arith.constant 0 : index
    %5 = vector.load %arg3[%c0_4, %c0_5] : memref<8x128xf32, #tpu.memory_space<vmem>>, vector<8x128xf32>
    %6 = arith.subf %4, %5 : vector<8x128xf32>
    %c0_6 = arith.constant 0 : index
    %c0_7 = arith.constant 0 : index
    %c0_8 = arith.constant 0 : index
    %7 = vector.load %arg5[%c0_6, %c0_7, %c0_8] : memref<1x8x1xf32, #tpu.memory_space<vmem>>, vector<1x8x1xf32>
    %8 = arith.mulf %6, %3 : vector<8x128xf32>
    %cst = arith.constant dense<0.000000e+00> : vector<8xf32>
    %9 = vector.multi_reduction <add>, %8, %cst [1] : vector<8x128xf32> to vector<8xf32>
    %10 = vector.shape_cast %9 : vector<8xf32> to vector<8x1xf32>
    %11 = vector.shape_cast %10 : vector<8x1xf32> to vector<1x8x1xf32>
    %12 = arith.addf %7, %11 : vector<1x8x1xf32>
    %c0_9 = arith.constant 0 : index
    %c0_10 = arith.constant 0 : index
    %c0_11 = arith.constant 0 : index
    %13 = vector.load %arg5[%c0_9, %c0_10, %c0_11] : memref<1x8x1xf32, #tpu.memory_space<vmem>>, vector<1x8x1xf32>
    tpu.vector_store %arg5[%c0_9, %c0_10, %c0_11], %12 {strides = array<i32>} : memref<1x8x1xf32, #tpu.memory_space<vmem>>, vector<1x8x1xf32>,
    %c0_12 = arith.constant 0 : index
    %c0_13 = arith.constant 0 : index
    %c0_14 = arith.constant 0 : index
    %14 = vector.load %arg6[%c0_12, %c0_13, %c0_14] : memref<1x8x1xf32, #tpu.memory_space<vmem>>, vector<1x8x1xf32>
    %15 = arith.mulf %3, %3 : vector<8x128xf32>
    %cst_15 = arith.constant dense<0.000000e+00> : vector<8xf32>
    %16 = vector.multi_reduction <add>, %15, %cst_15 [1] : vector<8x128xf32> to vector<8xf32>
    %17 = vector.shape_cast %16 : vector<8xf32> to vector<8x1xf32>
    %18 = vector.shape_cast %17 : vector<8x1xf32> to vector<1x8x1xf32>
    %19 = arith.addf %14, %18 : vector<1x8x1xf32>
    %c0_16 = arith.constant 0 : index
    %c0_17 = arith.constant 0 : index
    %c0_18 = arith.constant 0 : index
    %20 = vector.load %arg6[%c0_16, %c0_17, %c0_18] : memref<1x8x1xf32, #tpu.memory_space<vmem>>, vector<1x8x1xf32>
    tpu.vector_store %arg6[%c0_16, %c0_17, %c0_18], %19 {strides = array<i32>} : memref<1x8x1xf32, #tpu.memory_space<vmem>>, vector<1x8x1xf32>,
    return
  }
  func.func @transform_0(%arg0: i32, %arg1: i32) -> (i32, i32) {
    %c1_i32 = arith.constant 1 : i32
    %0 = arith.muli %arg0, %c1_i32 : i32
    %1 = arith.addi %0, %arg1 : i32
    %c1_i32_0 = arith.constant 1 : i32
    %2 = arith.minsi %1, %c1_i32_0 : i32
    %c0_i32 = arith.constant 0 : i32
    %c0_i32_1 = arith.constant 0 : i32
    return %c0_i32, %2 : i32, i32
  }
  func.func @transform_1(%arg0: i32, %arg1: i32) -> (i32, i32) {
    %c1_i32 = arith.constant 1 : i32
    %0 = arith.muli %arg0, %c1_i32 : i32
    %1 = arith.addi %0, %arg1 : i32
    %c1_i32_0 = arith.constant 1 : i32
    %2 = arith.minsi %1, %c1_i32_0 : i32
    %c0_i32 = arith.constant 0 : i32
    %c0_i32_1 = arith.constant 0 : i32
    return %c0_i32, %2 : i32, i32
  }
  func.func @transform_2(%arg0: i32, %arg1: i32) -> (i32, i32) {
    %c1_i32 = arith.constant 1 : i32
    %0 = arith.muli %arg0, %c1_i32 : i32
    %1 = arith.addi %0, %arg1 : i32
    %c1_i32_0 = arith.constant 1 : i32
    %2 = arith.minsi %1, %c1_i32_0 : i32
    %c0_i32 = arith.constant 0 : i32
    %c0_i32_1 = arith.constant 0 : i32
    return %c0_i32, %2 : i32, i32
  }
  func.func @transform_3(%arg0: i32, %arg1: i32) -> (i32, i32, i32) {
    %c0_i32 = arith.constant 0 : i32
    %c0_i32_0 = arith.constant 0 : i32
    %c0_i32_1 = arith.constant 0 : i32
    return %arg0, %c0_i32, %c0_i32_0 : i32, i32, i32
  }
  func.func @transform_4(%arg0: i32, %arg1: i32) -> (i32, i32, i32) {
    %c0_i32 = arith.constant 0 : i32
    %c0_i32_0 = arith.constant 0 : i32
    %c0_i32_1 = arith.constant 0 : i32
    return %arg0, %c0_i32, %c0_i32_0 : i32, i32, i32
  }
}

</mosaic_0001>

<bundles_post_ra>
// kernel: tpu_custom_call.1
= control target key start
LH: loop header
LB: loop body
LE: loop exit
PB: predicated region body
PF: predicated region fallthrough
CT: control target
= control target key end

     0   :  { %10 = vsyncpa [#allocation3], 0  ;;  %s977_s0 = inlined_call_operand.hbm [shape: f32[8,256], index: 0, kind: input, shape index: {}]   ;;  %s978_s1 = inlined_call_operand.hbm [shape: f32[8,256], index: 1, kind: input, shape index: {}]   ;;  %s979_s2 = inlined_call_operand.hbm [shape: f32[8,256], index: 2, kind: input, shape index: {}]   ;;  %s980_s3 = inlined_call_operand.vmem [shape: f32[2,8,1], index: 3, kind: output, shape index: {0}]   ;;  %s981_s4 = inlined_call_operand.vmem [shape: f32[2,8,1], index: 4, kind: output, shape index: {1}]  }
   0x1   :  { %12 = vsyncpa [#allocation3 + $0x1], 0 }
   0x2   :  { %13 = vsyncpa [#allocation5], 0 }
   0x3   :  { %15 = vsyncpa [#allocation5 + $0x1], 0  ;;  %s773_s15 = smov 0   ;;  %s775_s16 = smov 0  }
   0x4   :  { %s777_s17 = smov 0   ;;  %s779_s18 = smov 0  }
   0x5   :  { %s781_s19 = smov 0   ;;  %s783_s20 = smov 0  }
   0x6 LB: > { %s983_s21 = sadd.s32 4294967295, %s742_s20   ;;  %s33_s22 = sadd.s32 1, %s738_s19  ;;  %s742_s20 = sphi %s783_s20, %s21_s20   ;;  %s738_s19 = sphi %s781_s19, %s1000_s19   ;;  %s734_s18 = sphi %s779_s18, %s999_s18   ;;  %s730_s17 = sphi %s777_s17, %s998_s17   ;;  %s726_s16 = sphi %s775_s16, %s997_s16   ;;  %s722_s15 = sphi %s773_s15, %s996_s15  }
   0x7   : > { %p35_p0 = scmp.ge.s32.totalorder %s33_s22, 2  ;;  %p38_p1 = scmp.lt.s32.totalorder %s738_s19, 1 }
   0x8   : > { %s46_s23 = sadd.s32 1, %s730_s17  ;;  %p53_p2 = scmp.ne.s32.totalorder %s730_s17, %s726_s16 }
   0x9   : > { %s1002_s22 = smov (%p35_p0, %s33_s22), 0  ;;  %p54_p4 = scmp.eq.s32.totalorder %s742_s20, 0 }
   0xa   : > { %s39_s24 = scalar_select %p38_p1, %s738_s19, 1 }
   0xb   : > { %p41_p3 = scmp.lt.s32.totalorder %s1002_s22, 1  ;;  %p59_p5 = scmp.ne.s32.totalorder %s726_s16, %s722_s15 }
   0xc   : > { %p60_p6 = scmp.eq.s32.totalorder %s983_s21, 0  ;;  %p55_p7 = por %p54_p4, %p53_p2 }
   0xd   : > { %s42_s25 = scalar_select %p41_p3, %s1002_s22, 1 }
   0xe   : > { %p816_p8 = por %p60_p6, %p59_p5  ;;  %p548_p10 = scmp.lt.s32.totalorder %s742_s20, 2 }
   0xf   : > { %s43_s27 = ssub.s32 %s39_s24, %s42_s25  ;;  %s199_s28 = sand.u32 1, %s730_s17  }
  0x10   : > { %s986_s26 = scalar_select %p816_p8, 1, 0 }
  0x11   : > { %p44_p9 = scmp.eq.s32.totalorder %s43_s27, 0  ;;  %s822_s29 = sshll.u32 %s39_s24, 7 }
  0x12   : > { %s829_s5 = sshll.u32 %s199_s28, 3  ;;  %p831_p11 = pnand %p548_p10, %p55_p7 }
  0x13   : > { %s825_s30 = scalar_select %p44_p9, %s730_s17, %s46_s23  }
  0x14   : > { %s987_s6 = scalar_select %p831_p11, 1, 0 }
  0x15   : > { %s220_s7 = sand.u32 1, %s742_s20   ;;  %s840_s10 = scalar_lea.hbm %s978_s1, %s822_s29 }
  0x16   : > { %s224_s11 = scalar_lea.vmem [#allocation4], %s829_s5  ;;  %s846_s13 = scalar_lea.sflag [#allocation5], %s220_s7 }
  0x17   : > { %s234_s12 = sshll.u32 %s224_s11, 4  ;;  %s598_s14 = scalar_lea.hbm %s840_s10, 128  ;;  %s843_s12 = int_to_ptr.vmem [resolvable:$true] %s234_s12 }
  0x18   : > { %p599_p13 = scmp.ne.s32.totalorder %s840_s10, %s598_s14  ;;  %p852_p0 = pneg %p831_p11 }
  0x19   : > { %s603_s25 = scalar_lea.hbm %s978_s1, 256  ;;  %p604_p3 = scmp.lt.u32.totalorder %s840_s10, %s978_s1 }
  0x1a   : > { %p601_p1 = pnand %p852_p0, %p599_p13  ;;  %p605_p4 = scmp.lt.u32.totalorder %s603_s25, %s598_s14 }
  0x1b   : > { %p607_p6 = scmp.lt.u32.totalorder %s598_s14, %s840_s10 }
  0x1c   : > { %p602_p2 = pneg %p601_p1  ;;  %p606_p5 = por %p605_p4, %p604_p3 }
  0x1e   : > { %p608_p7 = por %p607_p6, %p606_p5 }
  0x20   : > { %p609_p9 = pnand %p608_p7, %p602_p2 }
  0x22   : > { %612 = shalt.err (!%p609_p9)
}
  0x23   : > { %s613_s7 = scalar_lea.vmem %s843_s12, 128  ;;  %s744_s9 = smov [#allocation4]  }
  0x24   : > { %p614_p10 = scmp.ne.s32.totalorder %s843_s12, %s613_s7  ;;  %s618_s11 = sshll.u32 %s744_s9, 4  ;;  %s619_s11 = int_to_ptr.vmem [resolvable:$false] %s618_s11 }
  0x25   : > { %s620_s23 = scalar_lea.vmem %s619_s11, 256  ;;  %p621_p12 = scmp.lt.s32.totalorder %s843_s12, %s619_s11 }
  0x26   : > { %p616_p13 = pnand %p614_p10, %p852_p0  ;;  %p622_p8 = scmp.lt.s32.totalorder %s620_s23, %s613_s7 }
  0x28   : > { %p617_p1 = pneg %p616_p13  ;;  %p623_p3 = por %p622_p8, %p621_p12 }
  0x2a   : > { %p624_p4 = pnand %p623_p3, %p617_p1 }
  0x2c   : > { %627 = shalt.err (!%p624_p4)
}
  0x2d   : > { %544 = dma.hbm_to_vmem [thread:$0]  (!%p831_p11), %s840_s10, 128, %s843_s12, %s846_s13  }
  0x2e   : > { %p260_p2 = scmp.lt.s32.totalorder %s742_s20, 3  ;;  %p989_p5 = scmp.ge.s32.totalorder %s742_s20, 1 }
  0x2f   : > { %s887_s27 = scalar_lea.hbm %s977_s0, %s822_s29  ;;  %s203_s8 = scalar_lea.vmem [#allocation2], %s829_s5 }
  0x30   : > { %p879_p6 = pnand %p989_p5, %p260_p2  ;;  %s213_s7 = sshll.u32 %s203_s8, 4  ;;  %s214_s7 = int_to_ptr.vmem [resolvable:$true] %s213_s7 }
  0x31   : > { %s200_s10 = scalar_lea.sflag [#allocation3], %s199_s28  ;;  %s628_s12 = scalar_lea.hbm %s887_s27, 128 }
  0x32   : > { %s990_s14 = scalar_select %p879_p6, 1, 0 }
  0x33   : > { %p629_p8 = scmp.ne.s32.totalorder %s887_s27, %s628_s12  ;;  %s633_s23 = scalar_lea.hbm %s977_s0, 256 }
  0x34   : > { %p634_p9 = scmp.lt.u32.totalorder %s887_s27, %s977_s0  ;;  %p635_p10 = scmp.lt.u32.totalorder %s633_s23, %s628_s12 }
  0x35   : > { %p631_p12 = pnand %p629_p8, %p852_p0  ;;  %p637_p1 = scmp.lt.u32.totalorder %s628_s12, %s887_s27 }
  0x36   : > { %p636_p13 = por %p635_p10, %p634_p9 }
  0x37   : > { %p632_p7 = pneg %p631_p12 }
  0x38   : > { %p638_p3 = por %p637_p1, %p636_p13 }
  0x3a   : > { %p639_p4 = pnand %p638_p3, %p632_p7 }
  0x3c   : > { %642 = shalt.err (!%p639_p4)
}
  0x3d   : > { %s643_s28 = scalar_lea.vmem %s214_s7, 128  ;;  %s745_s8 = smov [#allocation2]  }
  0x3e   : > { %p644_p2 = scmp.ne.s32.totalorder %s214_s7, %s643_s28  ;;  %s648_s21 = sshll.u32 %s745_s8, 4  ;;  %s649_s21 = int_to_ptr.vmem [resolvable:$false] %s648_s21 }
  0x3f   : > { %s650_s9 = scalar_lea.vmem %s649_s21, 256  ;;  %p651_p12 = scmp.lt.s32.totalorder %s214_s7, %s649_s21 }
  0x40   : > { %p646_p5 = pnand %p644_p2, %p852_p0  ;;  %p652_p6 = scmp.lt.s32.totalorder %s650_s9, %s643_s28 }
  0x42   : > { %p647_p8 = pneg %p646_p5  ;;  %p653_p11 = por %p652_p6, %p651_p12 }
  0x44   : > { %p654_p9 = pnand %p653_p11, %p647_p8 }
  0x46   : > { %657 = shalt.err (!%p654_p9)
}
  0x47   : > { %p991_p10 = scmp.ne.s32.totalorder %s987_s6, 0  ;;  %s913_s23 = scalar_lea.hbm %s979_s2, %s822_s29 }
  0x48   : > { %s245_s21 = scalar_lea.vmem [#allocation6], %s829_s5  ;;  %s658_s25 = scalar_lea.hbm %s913_s23, 128 }
  0x49   : > { %541 = dma.hbm_to_vmem [thread:$0]  (!%p991_p10), %s887_s27, 128, %s214_s7, %s200_s10  }
  0x4a   : > { %s255_s24 = sshll.u32 %s245_s21, 4  ;;  %p659_p11 = scmp.ne.s32.totalorder %s913_s23, %s658_s25  ;;  %s256_s24 = int_to_ptr.vmem [resolvable:$true] %s255_s24 }
  0x4b   : > { %s663_s27 = scalar_lea.hbm %s979_s2, 256  ;;  %p664_p13 = scmp.lt.u32.totalorder %s913_s23, %s979_s2 }
  0x4c   : > { %p661_p6 = pnand %p659_p11, %p852_p0  ;;  %p665_p1 = scmp.lt.u32.totalorder %s663_s27, %s658_s25 }
  0x4d   : > { %p667_p4 = scmp.lt.u32.totalorder %s658_s25, %s913_s23 }
  0x4e   : > { %p662_p7 = pneg %p661_p6  ;;  %p666_p3 = por %p665_p1, %p664_p13 }
  0x50   : > { %p668_p2 = por %p667_p4, %p666_p3 }
  0x52   : > { %p669_p5 = pnand %p668_p2, %p662_p7 }
  0x54   : > { %672 = shalt.err (!%p669_p5)
}
  0x55   : > { %s673_s29 = scalar_lea.vmem %s256_s24, 128  ;;  %s746_s5 = smov [#allocation6]  }
  0x56   : > { %p674_p8 = scmp.ne.s32.totalorder %s256_s24, %s673_s29  ;;  %s678_s9 = sshll.u32 %s746_s5, 4  ;;  %s679_s9 = int_to_ptr.vmem [resolvable:$false] %s678_s9 }
  0x57   : > { %s680_s12 = scalar_lea.vmem %s679_s9, 256  ;;  %p681_p11 = scmp.lt.s32.totalorder %s256_s24, %s679_s9 }
  0x58   : > { %p676_p12 = pnand %p674_p8, %p852_p0  ;;  %p682_p6 = scmp.lt.s32.totalorder %s680_s12, %s673_s29 }
  0x5a   : > { %p677_p9 = pneg %p676_p12  ;;  %p683_p10 = por %p682_p6, %p681_p11 }
  0x5c   : > { %p684_p1 = pnand %p683_p10, %p677_p9 }
  0x5e   : > { %687 = shalt.err (!%p684_p1)
}
  0x5f   : > { %p992_p13 = scmp.ne.s32.totalorder %s987_s6, 0  ;;  %p993_p7 = scmp.ne.s32.totalorder %s990_s14, 0 }
  0x60   : > { %s266_s15 = sand.u32 (!%p993_p7), 1, %s726_s16   ;;  %p994_p0 = scmp.ne.s32.totalorder (!%p993_p7), %s986_s26, 0 }
  0x61   : > { %547 = dma.hbm_to_vmem [thread:$0]  (!%p992_p13), %s913_s23, 128, %s256_s24, %s846_s13  }
  0x62   : > { %264 = sbr.rel (%p993_p7) target bundleno = 265 (0x109), region = 32  ;;  %s525_s11 = sshll.u32 (!%p993_p7), %s266_s15, 3 }
  0x63   : > { %s267_s21 = scalar_lea.sflag (!%p993_p7), [#allocation3], %s266_s15  ;;  %s270_s25 = scalar_lea.vmem (!%p993_p7), [#allocation2], %s525_s11 }
  0x69   : > { %713 = dma.done.wait (%p994_p0), %s267_s21, 128  }
  0x6a   : > { %715 = vsyncadd (%p994_p0), %s267_s21, 4294967168  ;;  %s995_s28 = sadd.s32 4294967295, %s742_s20   ;;  %s279_s13 = scalar_lea.vmem [#allocation4], %s525_s11 }
  0x6b   : > { %s275_s6 = sand.u32 1, %s995_s28  }
  0x6c   : > { %s276_s8 = scalar_lea.sflag [#allocation5], %s275_s6 }
  0x6d   : > { %717 = dma.done.wait (%p994_p0), %s276_s8, 256  }
  0x6e   : > { %719 = vsyncadd (%p994_p0), %s276_s8, 4294967040  ;;  %p335_p10 = scmp.lt.s32.totalorder %s734_s18, 1  ;;  %vm347_vm0 = vcmask 7168   ;;  %v747_v0 = vmov 0.0   ;;  %s288_s7 = scalar_lea.vmem [#allocation6], %s525_s11  ;;  %v351_v2 = vld [vmem:[%s270_s25] sm:$0xff] }
  0x6f   : > { %v350_v1 = vld [vmem:[%s288_s7] sm:$0xff]  ;;  %v352_v3 = vld [vmem:[%s279_s13] sm:$0xff] }
  0x70   : > { %s1004_s18 = smov (!%p335_p10, %s734_s18), 1  ;;  %v353_v4 = vsub.f32 %v351_v2, %v352_v3  ;;  %v362_v6 = vmul.f32 %v350_v1, %v350_v1 }
  0x71   : > { %s528_s14 = sshll.u32 %s1004_s18, 3 }
  0x72   : > { %s338_s27 = scalar_lea.vmem %s980_s3, %s528_s14  ;;  %v355_v5 = vmul.f32 %v353_v4, %v350_v1  ;;  %s342_s18 = scalar_lea.vmem %s981_s4, %s528_s14 }
  0x73   : > { %348 = vst.msk [vmem:[%s338_s27] sm:$0xff] %vm347_vm0, %v747_v0  ;;  %349 = vst.msk [vmem:[%s342_s18] sm:$0xff] %vm347_vm0, %v747_v0 }
  0x74   : > { %356 = vadd.xlane.f32.xlu0 %v355_v5 }
  0x78   : > { %363 = vadd.xlane.f32.xlu0 %v362_v6 }
  0x7a   : > { %v354_v7 = vld [vmem:[%s338_s27] sm:$0xff] }
  0x7b   : > { %v361_v10 = vld [vmem:[%s342_s18] sm:$0xff] }
 0x101   : > { %v357_v8 = vpop.xlane.xlu0 %356 }
 0x102   : > { %v358_v9 = vadd.f32 %v357_v8, %v354_v7 }
 0x104   : > { %360 = vst.msk [vmem:[%s338_s27] sm:$0xff] %vm347_vm0, %v358_v9 }
 0x105   : > { %v364_v11 = vpop.xlane.xlu0 %363 }
 0x106   : > { %v365_v12 = vadd.f32 %v364_v11, %v361_v10 }
 0x108   : > { %366 = vst.msk [vmem:[%s342_s18] sm:$0xff] %vm347_vm0, %v365_v12 }
 0x109 PF: > { %s21_s20 = sadd.s32 1, %s742_s20   ;;  %s996_s15 = smov %s726_s16 }
 0x10a   : > { %p18_p3 = scmp.ge.s32.totalorder %s21_s20, 4   ;;  %s997_s16 = smov %s730_s17 }
 0x10b   : > { %s998_s17 = smov %s825_s30  ;;  %s999_s18 = smov %s738_s19 }
 0x10c   : > { %s1000_s19 = smov %s1002_s22  ;;  %20 = sbr.rel (!%p18_p3) target bundleno = 6 (0x6), region = 112 }
 0x113   :  { %400 = vsyncpa [#allocation3], 1 }
 0x114   :  { %402 = vsyncpa [#allocation3 + $0x1], 1 }
 0x115   :  { %403 = vsyncpa [#allocation5], 1 }
 0x116   :  { %405 = vsyncpa [#allocation5 + $0x1], 1 }

</bundles_post_ra>
